<compile_context>
chip_gen: v6e
topology: v6e:2x2x1
jax: 0.10.0
libtpu: 0.0.40
codegen_flags: <defaults>
</compile_context>

<pallas_src>
import functools

import jax
import jax.numpy as jnp
from jax.experimental import pallas as pl
from jax.experimental.pallas import tpu as pltpu


def _conv1x1_fused_kernel(x_ref, w_ref, b_ref, o_ref):
    # x_ref: (Cin, T)  w_ref: (Cout, Cin)  b_ref: (Cout, 1)  o_ref: (Cout, T)
    x = x_ref[...]                          # lanes = spatial positions
    w = w_ref[...]
    cin = x.shape[0]

    # Channel contraction as VPU broadcast-FMAs; accumulator seeded with the
    # folded (bias + 3) term so there is no separate bias-add pass.
    acc = b_ref[...] + w[:, 0:1] * x[0:1, :]          # (Cout, T)
    for k in range(1, cin):
        acc = acc + w[:, k:k + 1] * x[k:k + 1, :]

    acc = jnp.maximum(acc, 0.0)                       # relu(conv + 3)
    # hardtanh(t2/5, 0, 6): t2 >= 0 after the relu, so only the upper clamp.
    o_ref[...] = jnp.minimum(acc * 0.2, 6.0).astype(o_ref.dtype)


def _pick_spatial_tile(S, N):
    """Lane-dense, VMEM-bounded spatial tiling over the padded spatial axis."""
    MAX_TILE = 32768          # lanes; 128*32768 B/block-pair ~= 4 MiB << 24 MiB budget
    MAX_FULL_EXTENT = 65536   # largest single full-extent block we allow (~8 MiB)

    if S % 128 == 0:
        tile = min(S, MAX_TILE)
        num_tiles = pl.cdiv(S, tile)
        # Guarantee >= 2 parallel blocks so both v7x TensorCores get work.
        if N * num_tiles < 2 and S >= 256:
            tile = ((S // 2) + 127) // 128 * 128
            num_tiles = pl.cdiv(S, tile)
    elif S <= MAX_FULL_EXTENT:
        # Small non-128-aligned extent (e.g. the tested 20*20=400): a single
        # full-extent block per batch element -> fewest grid steps, tiny VMEM.
        tile, num_tiles = S, 1
    else:
        # Large non-aligned extent: 128-multiple tiles + ragged last block so
        # the block never exceeds the VMEM budget (fixes the old tile=HW path).
        tile = MAX_TILE
        num_tiles = pl.cdiv(S, tile)
    return tile, num_tiles


@functools.partial(jax.jit, static_argnames=("padding",))
def conv1x1_relu_hardtanh(x_nchw, weight, bias, padding=2):
    """x_nchw: (N, Cin, H, W) f32; weight: (Cout, Cin, 1, 1); bias: (Cout,)."""
    N, Cin, H, W = x_nchw.shape
    Cout = weight.shape[0]
    Hp, Wp = H + 2 * padding, W + 2 * padding
    S = Hp * Wp

    # Zero-pad the Cin=4 input once; the kernel then emits the full padded
    # output (border pixels come out as the correct per-channel constant).
    x_pad = jnp.pad(x_nchw, ((0, 0), (0, 0), (padding, padding), (padding, padding)))
    x3 = x_pad.reshape(N, Cin, S)            # pure reshape, no transpose
    w2 = weight.reshape(Cout, Cin)
    b2 = (bias + 3.0).reshape(Cout, 1)       # fold the +3 into the bias

    tile, num_tiles = _pick_spatial_tile(S, N)

    out = pl.pallas_call(
        _conv1x1_fused_kernel,
        out_shape=jax.ShapeDtypeStruct((N, Cout, S), x_nchw.dtype),
        grid=(N, num_tiles),
        in_specs=[
            pl.BlockSpec((None, Cin, tile), lambda n, t: (n, 0, t)),
            pl.BlockSpec((Cout, Cin), lambda n, t: (0, 0)),
            pl.BlockSpec((Cout, 1), lambda n, t: (0, 0)),
        ],
        out_specs=pl.BlockSpec((None, Cout, tile), lambda n, t: (n, 0, t)),
        compiler_params=pltpu.CompilerParams(
            dimension_semantics=("parallel", "parallel"),
            vmem_limit_bytes=32 * 1024 * 1024,
        ),
        cost_estimate=pl.CostEstimate(
            flops=2 * N * S * Cin * Cout,
            transcendentals=0,
            bytes_accessed=4 * N * S * (Cin + Cout),
        ),
    )(x3, w2, b2)

    return out.reshape(N, Cout, Hp, Wp)


if __name__ == "__main__":
    key = jax.random.PRNGKey(0)
    kx, kw, kb = jax.random.split(key, 3)

    N, Cin, H, W = 2, 4, 16, 16
    Cout = 8

    x = jax.random.normal(kx, (N, Cin, H, W), dtype=jnp.float32)

    # PyTorch-style uniform(-1/sqrt(fan_in), 1/sqrt(fan_in)) init.
    fan_in = Cin * 1 * 1
    bound = 1.0 / (fan_in ** 0.5)
    weight = jax.random.uniform(kw, (Cout, Cin, 1, 1), minval=-bound, maxval=bound,
                                dtype=jnp.float32)
    bias = jax.random.uniform(kb, (Cout,), minval=-bound, maxval=bound,
                              dtype=jnp.float32)

    out = conv1x1_relu_hardtanh(x, weight, bias, padding=2)
    jax.block_until_ready(out)

    # Reference (plain JAX, matching PyTorch semantics).
    x_pad = jnp.pad(x, ((0, 0), (0, 0), (2, 2), (2, 2)))
    t1 = jnp.einsum('ncij,oc->noij', x_pad, weight.reshape(Cout, Cin)) \
        + bias[None, :, None, None]
    t2 = jnp.maximum(t1 + 3.0, 0.0)
    ref = jnp.clip(t2 / 5.0, 0.0, 6.0)

    assert out.shape == (N, Cout, H + 4, W + 4), out.shape
    assert jnp.allclose(out, ref, atol=1e-5, rtol=1e-5)

    print("KERNEL_OK")
</pallas_src>

<mosaic_0001>
module attributes {stable_mosaic.version = 11 : i64} {
  func.func @_conv1x1_fused_kernel(%arg0: i32, %arg1: i32, %arg2: memref<1x4x400xf32, #tpu.memory_space<vmem>>, %arg3: memref<8x4xf32, #tpu.memory_space<vmem>>, %arg4: memref<8x1xf32, #tpu.memory_space<vmem>>, %arg5: memref<1x8x400xf32, #tpu.memory_space<vmem>>) attributes {dimension_semantics = [#tpu.dimension_semantics<parallel>, #tpu.dimension_semantics<parallel>], iteration_bounds = array<i64: 2, 1>, scalar_prefetch = 0 : i64, scratch_operands = 0 : i64, tpu.core_type = #tpu.core_type<tc>, window_params = [{transform_indices = @transform_0, window_bounds = array<i64: 1, 4, 400>}, {pipeline_mode = #tpu.pipeline_mode<synchronous>, transform_indices = @transform_1, window_bounds = array<i64: 8, 4>}, {pipeline_mode = #tpu.pipeline_mode<synchronous>, transform_indices = @transform_2, window_bounds = array<i64: 8, 1>}, {transform_indices = @transform_3, window_bounds = array<i64: 1, 8, 400>}]} {
    %c0 = arith.constant 0 : index
    %c0_0 = arith.constant 0 : index
    %c0_1 = arith.constant 0 : index
    %0 = vector.load %arg2[%c0, %c0_0, %c0_1] : memref<1x4x400xf32, #tpu.memory_space<vmem>>, vector<1x4x400xf32>
    %1 = vector.shape_cast %0 : vector<1x4x400xf32> to vector<4x400xf32>
    %c0_2 = arith.constant 0 : index
    %c0_3 = arith.constant 0 : index
    %2 = vector.load %arg3[%c0_2, %c0_3] : memref<8x4xf32, #tpu.memory_space<vmem>>, vector<8x4xf32>
    %c0_4 = arith.constant 0 : index
    %c0_5 = arith.constant 0 : index
    %3 = vector.load %arg4[%c0_4, %c0_5] : memref<8x1xf32, #tpu.memory_space<vmem>>, vector<8x1xf32>
    %4 = vector.extract_strided_slice %2 {offsets = [0, 0], sizes = [8, 1], strides = [1, 1]} : vector<8x4xf32> to vector<8x1xf32>
    %5 = vector.extract_strided_slice %1 {offsets = [0, 0], sizes = [1, 400], strides = [1, 1]} : vector<4x400xf32> to vector<1x400xf32>
    %6 = vector.broadcast %4 : vector<8x1xf32> to vector<8x400xf32>
    %7 = vector.broadcast %5 : vector<1x400xf32> to vector<8x400xf32>
    %8 = arith.mulf %6, %7 : vector<8x400xf32>
    %9 = vector.broadcast %3 : vector<8x1xf32> to vector<8x400xf32>
    %10 = arith.addf %9, %8 : vector<8x400xf32>
    %11 = vector.extract_strided_slice %2 {offsets = [0, 1], sizes = [8, 1], strides = [1, 1]} : vector<8x4xf32> to vector<8x1xf32>
    %12 = vector.extract_strided_slice %1 {offsets = [1, 0], sizes = [1, 400], strides = [1, 1]} : vector<4x400xf32> to vector<1x400xf32>
    %13 = vector.broadcast %11 : vector<8x1xf32> to vector<8x400xf32>
    %14 = vector.broadcast %12 : vector<1x400xf32> to vector<8x400xf32>
    %15 = arith.mulf %13, %14 : vector<8x400xf32>
    %16 = arith.addf %10, %15 : vector<8x400xf32>
    %17 = vector.extract_strided_slice %2 {offsets = [0, 2], sizes = [8, 1], strides = [1, 1]} : vector<8x4xf32> to vector<8x1xf32>
    %18 = vector.extract_strided_slice %1 {offsets = [2, 0], sizes = [1, 400], strides = [1, 1]} : vector<4x400xf32> to vector<1x400xf32>
    %19 = vector.broadcast %17 : vector<8x1xf32> to vector<8x400xf32>
    %20 = vector.broadcast %18 : vector<1x400xf32> to vector<8x400xf32>
    %21 = arith.mulf %19, %20 : vector<8x400xf32>
    %22 = arith.addf %16, %21 : vector<8x400xf32>
    %23 = vector.extract_strided_slice %2 {offsets = [0, 3], sizes = [8, 1], strides = [1, 1]} : vector<8x4xf32> to vector<8x1xf32>
    %24 = vector.extract_strided_slice %1 {offsets = [3, 0], sizes = [1, 400], strides = [1, 1]} : vector<4x400xf32> to vector<1x400xf32>
    %25 = vector.broadcast %23 : vector<8x1xf32> to vector<8x400xf32>
    %26 = vector.broadcast %24 : vector<1x400xf32> to vector<8x400xf32>
    %27 = arith.mulf %25, %26 : vector<8x400xf32>
    %28 = arith.addf %22, %27 : vector<8x400xf32>
    %cst = arith.constant 0.000000e+00 : f32
    %29 = vector.broadcast %cst : f32 to vector<8x400xf32>
    %30 = arith.maximumf %28, %29 : vector<8x400xf32>
    %cst_6 = arith.constant 2.000000e-01 : f32
    %31 = vector.broadcast %cst_6 : f32 to vector<8x400xf32>
    %32 = arith.mulf %30, %31 : vector<8x400xf32>
    %cst_7 = arith.constant 6.000000e+00 : f32
    %33 = vector.broadcast %cst_7 : f32 to vector<8x400xf32>
    %34 = arith.minimumf %32, %33 : vector<8x400xf32>
    %c0_8 = arith.constant 0 : index
    %c0_9 = arith.constant 0 : index
    %c0_10 = arith.constant 0 : index
    %35 = vector.load %arg5[%c0_8, %c0_9, %c0_10] : memref<1x8x400xf32, #tpu.memory_space<vmem>>, vector<1x8x400xf32>
    %36 = vector.shape_cast %35 : vector<1x8x400xf32> to vector<8x400xf32>
    %37 = vector.shape_cast %34 : vector<8x400xf32> to vector<1x8x400xf32>
    tpu.vector_store %arg5[%c0_8, %c0_9, %c0_10], %37 {strides = array<i32>} : memref<1x8x400xf32, #tpu.memory_space<vmem>>, vector<1x8x400xf32>,
    return
  }
  func.func @transform_0(%arg0: i32, %arg1: i32) -> (i32, i32, i32) {
    %c0_i32 = arith.constant 0 : i32
    %c0_i32_0 = arith.constant 0 : i32
    return %arg0, %c0_i32, %arg1 : i32, i32, i32
  }
  func.func @transform_1(%arg0: i32, %arg1: i32) -> (i32, i32) {
    %c0_i32 = arith.constant 0 : i32
    %c0_i32_0 = arith.constant 0 : i32
    %c0_i32_1 = arith.constant 0 : i32
    return %c0_i32, %c0_i32_0 : i32, i32
  }
  func.func @transform_2(%arg0: i32, %arg1: i32) -> (i32, i32) {
    %c0_i32 = arith.constant 0 : i32
    %c0_i32_0 = arith.constant 0 : i32
    %c0_i32_1 = arith.constant 0 : i32
    return %c0_i32, %c0_i32_0 : i32, i32
  }
  func.func @transform_3(%arg0: i32, %arg1: i32) -> (i32, i32, i32) {
    %c0_i32 = arith.constant 0 : i32
    %c0_i32_0 = arith.constant 0 : i32
    return %arg0, %c0_i32, %arg1 : i32, i32, i32
  }
}

</mosaic_0001>

<bundles_post_ra>
// kernel: conv1x1_relu_hardtanh.1
= control target key start
LH: loop header
LB: loop body
LE: loop exit
PB: predicated region body
PF: predicated region fallthrough
CT: control target
= control target key end

     0   :  { %s611_s12 = smov 0   ;;  %s613_s13 = smov 0   ;;  %s662_s0 = inlined_call_operand.vmem [shape: f32[2,4,400], index: 0, kind: input, shape index: {}]   ;;  %s663_s1 = inlined_call_operand.vmem [shape: f32[8,4], index: 1, kind: input, shape index: {}]   ;;  %s664_s2 = inlined_call_operand.vmem [shape: f32[8,1], index: 2, kind: input, shape index: {}]   ;;  %s665_s3 = inlined_call_operand.vmem [shape: f32[2,8,400], index: 3, kind: output, shape index: {}]  }
   0x1   :  { %s615_s14 = smov 0  }
   0x2 LB: > { %s25_s15 = sadd.s32 1, %s581_s13  ;;  %p522_p0 = scmp.ge.s32.totalorder %s585_s14, 1  ;;  %s585_s14 = sphi %s615_s14, %s13_s14   ;;  %s581_s13 = sphi %s613_s13, %s667_s13   ;;  %s577_s12 = sphi %s611_s12, %s666_s12  }
   0x3   : > { %p27_p1 = scmp.ge.s32.totalorder %s25_s15, 2  ;;  %p158_p2 = scmp.lt.s32.totalorder %s585_s14, 3 }
   0x5   : > { %s669_s15 = smov (%p27_p1, %s25_s15), 0  ;;  %p159_p3 = pnand %p522_p0, %p158_p2 }
   0x6   : > { %p191_p4 = scmp.lt.s32.totalorder (!%p159_p3), %s577_s12, 1 }
   0x7   : > { %162 = sbr.rel (%p159_p3) target bundleno = 159 (0x9f), region = 32 }
   0xc   : > { %v212_v0 = vld [vmem:[%s663_s1] sm:$0xff]  ;;  %v587_v1 = vmov 0   ;;  %v588_v2 = vmov 1   ;;  %v589_v4 = vmov 2   ;;  %v590_v5 = vmov 3   ;;  %s671_s12 = smov (!%p191_p4, %s577_s12), 1 }
   0xd   : > { %559 = vset.pattern.permute.xlu0 %v587_v1  ;;  %560 = vset.pattern.permute.xlu1 %v588_v2  ;;  %v213_v3 = vld [vmem:[%s664_s2] sm:$0xff]  ;;  %v221_v6 = vlaneseq  ;;  %s529_s20 = sshll.u32 %s671_s12, 4  ;;  %s530_s24 = sshll.u32 %s671_s12, 5  ;;  %vm429_vm0 = vcmask 130048  }
   0xe   : > { %216 = vperm.xlu0 %559, %v212_v0   ;;  %271 = vperm.xlu1 %560, %v212_v0   ;;  %s198_s23 = scalar_lea.vmem %s662_s0, %s529_s20  ;;  %s208_s27 = scalar_lea.vmem %s665_s3, %s530_s24 }
   0xf   : > { %v222_v7 = vshrl.u32 %v221_v6, 7  ;;  %v210_v10 = vld [vmem:[%s198_s23] sm:$0xff]  ;;  %v211_v11 = vld [vmem:[%s198_s23 + $0x8] sm:$0xff] }
  0x11   : > { %v223_v8 = vsub.s32 0, %v222_v7  ;;  %v227_v9 = vsub.s32 4, %v222_v7  ;;  %v276_v12 = vsub.s32 1, %v222_v7  ;;  %v280_v13 = vsub.s32 5, %v222_v7 }
  0x12   : > { %263 = vperm.xlu0 %559, %v213_v3   ;;  %561 = vset.pattern.permute.xlu1 %v589_v4  ;;  %v324_v14 = vsub.s32 2, %v222_v7  ;;  %v328_v15 = vsub.s32 6, %v222_v7  ;;  %v641_v16 = vsub.s32 3, %v222_v7  ;;  %v376_v17 = vsub.s32 7, %v222_v7 }
  0x13   : > { %319 = vperm.xlu1 %561, %v212_v0   ;;  %v224_v18 = vrot.slane %v210_v10, %v223_v8  ;;  %v228_v19 = vrot.slane %v210_v10, %v227_v9  ;;  %v232_v20 = vrot.slane %v211_v11, %v223_v8  ;;  %v236_v21 = vrot.slane %v211_v11, %v227_v9 }
  0x14   : > { %v277_v22 = vrot.slane %v210_v10, %v276_v12  ;;  %v281_v23 = vrot.slane %v210_v10, %v280_v13  ;;  %v285_v24 = vrot.slane %v211_v11, %v276_v12  ;;  %v289_v25 = vrot.slane %v211_v11, %v280_v13 }
  0x15   : > { %v325_v26 = vrot.slane %v210_v10, %v324_v14  ;;  %v329_v27 = vrot.slane %v210_v10, %v328_v15  ;;  %v333_v28 = vrot.slane %v211_v11, %v324_v14  ;;  %v337_v29 = vrot.slane %v211_v11, %v328_v15 }
  0x16   : > { %562 = vset.pattern.permute.xlu0 %v590_v5  ;;  %v373_v30 = vrot.slane %v210_v10, %v641_v16  ;;  %v377_v31 = vrot.slane %v210_v10, %v376_v17  ;;  %v381_v32 = vrot.slane %v211_v11, %v641_v16  ;;  %v385_v33 = vrot.slane %v211_v11, %v376_v17 }
  0x17   : > { %367 = vperm.xlu0 %562, %v212_v0   ;;  %v244_v34 = vrot.slane %v224_v18, %v223_v8  ;;  %v248_v35 = vrot.slane %v228_v19, %v223_v8  ;;  %v252_v36 = vrot.slane %v232_v20, %v223_v8  ;;  %v256_v37 = vrot.slane %v236_v21, %v223_v8 }
  0x18   : > { %v297_v40 = vrot.slane %v277_v22, %v276_v12  ;;  %v301_v41 = vrot.slane %v281_v23, %v276_v12  ;;  %v305_v42 = vrot.slane %v285_v24, %v276_v12  ;;  %v309_v43 = vrot.slane %v289_v25, %v276_v12 }
  0x19   : > { %v345_v44 = vrot.slane %v325_v26, %v324_v14  ;;  %v349_v45 = vrot.slane %v329_v27, %v324_v14  ;;  %v353_v46 = vrot.slane %v333_v28, %v324_v14  ;;  %v357_v47 = vrot.slane %v337_v29, %v324_v14 }
  0x1a   : > { %v393_v48 = vrot.slane %v373_v30, %v641_v16  ;;  %v397_v49 = vrot.slane %v377_v31, %v641_v16  ;;  %v401_v50 = vrot.slane %v381_v32, %v641_v16  ;;  %v405_v51 = vrot.slane %v385_v33, %v641_v16 }
  0x89   : > { %v217_v38 = vpop.permute.xlu0 %216  ;;  %v272_v39 = vpop.permute.xlu1 %271 }
  0x8a   : > { %v257_v52 = vmul.f32 %v244_v34, %v217_v38  ;;  %v258_v53 = vmul.f32 %v248_v35, %v217_v38  ;;  %v259_v54 = vmul.f32 %v252_v36, %v217_v38  ;;  %v260_v55 = vmul.f32 %v256_v37, %v217_v38 }
  0x8b   : > { %v310_v56 = vmul.f32 %v297_v40, %v272_v39  ;;  %v311_v57 = vmul.f32 %v301_v41, %v272_v39  ;;  %v312_v58 = vmul.f32 %v305_v42, %v272_v39  ;;  %v313_v59 = vmul.f32 %v309_v43, %v272_v39 }
  0x8d   : > { %v264_v60 = vpop.permute.xlu0 %263 }
  0x8e   : > { %v266_v61 = vadd.f32 %v264_v60, %v257_v52  ;;  %v267_v62 = vadd.f32 %v264_v60, %v258_v53  ;;  %v268_v63 = vadd.f32 %v264_v60, %v259_v54  ;;  %v269_v0 = vadd.f32 %v264_v60, %v260_v55  ;;  %v320_v1 = vpop.permute.xlu1 %319 }
  0x8f   : > { %v358_v2 = vmul.f32 %v345_v44, %v320_v1  ;;  %v359_v3 = vmul.f32 %v349_v45, %v320_v1  ;;  %v360_v4 = vmul.f32 %v353_v46, %v320_v1  ;;  %v361_v5 = vmul.f32 %v357_v47, %v320_v1 }
  0x90   : > { %v314_v6 = vadd.f32 %v310_v56, %v266_v61  ;;  %v315_v7 = vadd.f32 %v311_v57, %v267_v62  ;;  %v316_v8 = vadd.f32 %v312_v58, %v268_v63  ;;  %v317_v9 = vadd.f32 %v313_v59, %v269_v0 }
  0x92   : > { %v362_v10 = vadd.f32 %v358_v2, %v314_v6  ;;  %v363_v11 = vadd.f32 %v359_v3, %v315_v7  ;;  %v364_v12 = vadd.f32 %v360_v4, %v316_v8  ;;  %v365_v13 = vadd.f32 %v361_v5, %v317_v9  ;;  %v368_v14 = vpop.permute.xlu0 %367 }
  0x93   : > { %v406_v15 = vmul.f32 %v393_v48, %v368_v14  ;;  %v407_v16 = vmul.f32 %v397_v49, %v368_v14  ;;  %v408_v17 = vmul.f32 %v401_v50, %v368_v14  ;;  %v409_v18 = vmul.f32 %v405_v51, %v368_v14 }
  0x95   : > { %v410_v19 = vadd.f32 %v406_v15, %v362_v10  ;;  %v411_v20 = vadd.f32 %v407_v16, %v363_v11  ;;  %v412_v21 = vadd.f32 %v408_v17, %v364_v12  ;;  %v413_v22 = vadd.f32 %v409_v18, %v365_v13 }
  0x97   : > { %v414_v23 = vmax.f32 %v410_v19, 0.0  ;;  %v415_v24 = vmax.f32 %v411_v20, 0.0  ;;  %v416_v25 = vmax.f32 %v412_v21, 0.0  ;;  %v417_v26 = vmax.f32 %v413_v22, 0.0 }
  0x99   : > { %v418_v27 = vmul.f32 0.2, %v414_v23  ;;  %v419_v28 = vmul.f32 0.2, %v415_v24  ;;  %v420_v29 = vmul.f32 0.2, %v416_v25 }
  0x9a   : > { %v421_v30 = vmul.f32 0.2, %v417_v26 }
  0x9b   : > { %v422_v31 = vmin.f32 %v418_v27, 6.0  ;;  %v423_v32 = vmin.f32 %v419_v28, 6.0  ;;  %v424_v33 = vmin.f32 %v420_v29, 6.0 }
  0x9c   : > { %v425_v34 = vmin.f32 %v421_v30, 6.0 }
  0x9d   : > { %426 = vst [vmem:[%s208_s27] sm:$0xff] %v422_v31  ;;  %427 = vst [vmem:[%s208_s27 + $0x8] sm:$0xff] %v423_v32 }
  0x9e   : > { %428 = vst [vmem:[%s208_s27 + $0x10] sm:$0xff] %v424_v33  ;;  %430 = vst.msk [vmem:[%s208_s27 + $0x18] sm:$0xff] %vm429_vm0, %v425_v34 }
  0x9f PF: > { %s13_s14 = sadd.s32 1, %s585_s14   ;;  %s666_s12 = smov %s581_s13 }
  0xa0   : > { %p10_p5 = scmp.ge.s32.totalorder %s13_s14, 4   ;;  %s667_s13 = smov %s669_s15 }
  0xa2   :  { %12 = sbr.rel (!%p10_p5) target bundleno = 2 (0x2), region = 62 }

</bundles_post_ra>
